<compile_context>
chip_gen: v7x
topology: tpu7x:2x2x1
jax: 0.10.0
libtpu: 0.0.40
codegen_flags: <defaults>
</compile_context>

<pallas_src>
import functools
import math

import jax
import jax.numpy as jnp
from jax import lax
from jax.experimental import pallas as pl
from jax.experimental.pallas import tpu as pltpu


def _cln_kernel(x_ref, p_ref, o_ref, *, eps, n):
    """x_ref/o_ref: (tb, 2n), lanes interleaved as (re0, im0, re1, im1, ...).

    p_ref: (3, 2n) packed parameters
      row 0: same-lane gain    [grr_0, gii_0, grr_1, gii_1, ...]
      row 1: partner-lane gain [gri_0, gri_0, gri_1, gri_1, ...]
      row 2: bias              [beta_r0, beta_i0, beta_r1, beta_i1, ...]
    """
    two_n = 2 * n
    inv_n = 1.0 / n
    # torch.var is unbiased (ddof=1); N == 1 gives NaN, same as PyTorch.
    inv_nm1 = (1.0 / (n - 1)) if n > 1 else float("nan")

    x = x_ref[...].astype(jnp.float32)

    lane = lax.broadcasted_iota(jnp.int32, x.shape, 1)
    is_re = (lane & 1) == 0                      # even lanes = real, odd lanes = imag

    zero = jnp.zeros_like(x)
    sum_re = jnp.sum(jnp.where(is_re, x, zero), axis=-1, keepdims=True)
    sum_im = jnp.sum(jnp.where(is_re, zero, x), axis=-1, keepdims=True)
    mean = jnp.where(is_re, sum_re, sum_im) * inv_n      # interleaved per-component mean

    c = x - mean
    # sum over all 2n lanes of c^2 == (n-1)*(var_re + var_im)  (unbiased)
    ss = jnp.sum(c * c, axis=-1, keepdims=True)
    inv_std = lax.rsqrt(ss * inv_nm1 + eps)
    xn = c * inv_std

    p = p_ref[...].astype(jnp.float32)
    g_diag = p[0:1, :]
    g_cross = p[1:2, :]
    bias = p[2:3, :]

    # Swap adjacent (re, im) lane pairs of u = xn * g_cross:
    #   partner[2k] = u[2k+1], partner[2k+1] = u[2k]
    # (wrap-around lanes from the cyclic roll are discarded by the parity select)
    u = xn * g_cross
    nxt = pltpu.roll(u, two_n - 1, 1)   # nxt[j] = u[(j + 1) % 2n]
    prv = pltpu.roll(u, 1, 1)           # prv[j] = u[(j - 1) % 2n]
    partner = jnp.where(is_re, nxt, prv)

    o_ref[...] = (xn * g_diag + partner + bias).astype(o_ref.dtype)


def complex_layer_norm(x, beta, gamma_rr, gamma_ii, gamma_ri, eps=1e-9,
                       *, target_block_bytes=2 << 20, vmem_limit_bytes=32 << 20):
    """x: [..., N, 2]. Returns same shape/dtype as x."""
    *lead, n, two = x.shape
    assert two == 2, "last dim must hold (real, imag)"
    two_n = 2 * n
    b = math.prod(lead) if lead else 1

    # Free, contiguous reshape: [..., N, 2] -> (B, 2N) interleaved rows (no HBM pass).
    x2 = x.reshape(b, two_n)

    # Pack the five parameter vectors into a single small resident block.
    g_diag = jnp.stack([gamma_rr, gamma_ii], axis=-1).reshape(1, two_n)
    g_cross = jnp.stack([gamma_ri, gamma_ri], axis=-1).reshape(1, two_n)
    bias = beta.reshape(1, two_n)
    params = jnp.concatenate([g_diag, g_cross, bias], axis=0).astype(jnp.float32)

    # Batch tile: multiple of the sublane granule, ~target_block_bytes per buffer,
    # and at least 2 grid steps when the batch allows (keeps both v7x TCs busy).
    itemsize = x2.dtype.itemsize
    sublane = 8 * max(1, 4 // itemsize)
    row_bytes = two_n * itemsize
    tb = max(sublane, min(b, target_block_bytes // max(row_bytes, 1)))
    tb = max(sublane, (tb // sublane) * sublane)
    if b >= 2 * sublane:
        tb = min(tb, max(sublane, (((b + 1) // 2) // sublane) * sublane))

    b_pad = pl.cdiv(b, tb) * tb
    if b_pad != b:
        # Zero-padded rows produce finite junk (bias) that is sliced off below.
        x2 = jnp.pad(x2, ((0, b_pad - b), (0, 0)))

    row_spec = pl.BlockSpec((tb, two_n), lambda i: (i, 0))
    par_spec = pl.BlockSpec((3, two_n), lambda i: (0, 0))

    y2 = pl.pallas_call(
        functools.partial(_cln_kernel, eps=float(eps), n=n),
        out_shape=jax.ShapeDtypeStruct((b_pad, two_n), x.dtype),
        grid_spec=pltpu.PrefetchScalarGridSpec(
            num_scalar_prefetch=0,
            grid=(b_pad // tb,),
            in_specs=[row_spec, par_spec],
            out_specs=row_spec,
        ),
        compiler_params=pltpu.CompilerParams(
            dimension_semantics=("parallel",),
            vmem_limit_bytes=vmem_limit_bytes,
        ),
    )(x2, params)

    if b_pad != b:
        y2 = y2[:b]
    return y2.reshape(*lead, n, 2)


def complex_layer_norm_ref(x, beta, gamma_rr, gamma_ii, gamma_ri, eps=1e-9):
    """Pure-JAX reference mirroring the PyTorch module exactly."""
    x_mean = jnp.mean(x, axis=-2, keepdims=True)
    x_real_var = jnp.var(x[..., 0], axis=-1, ddof=1)
    x_imag_var = jnp.var(x[..., 1], axis=-1, ddof=1)
    x_var = x_real_var + x_imag_var
    x_div = jnp.sqrt(x_var + eps)[..., None, None]
    xc = (x - x_mean) / x_div
    xr, xi = xc[..., 0], xc[..., 1]
    out = jnp.stack([xr * gamma_rr + xi * gamma_ri,
                     xr * gamma_ri + xi * gamma_ii], axis=-1)
    return out + beta


if __name__ == "__main__":
    key = jax.random.PRNGKey(0)
    k_x, k_b, k_rr, k_ii, k_ri = jax.random.split(key, 5)

    # normalized_shape = 64 -> interleaved lane width 2N = 128 (lane-dense, unmasked stores);
    # B = 2*128 = 256 rows -> tile 128 rows, grid = (2,) so both v7x TensorCores get work.
    batch, seq, n = 2, 128, 64
    x = jax.random.normal(k_x, (batch, seq, n, 2), dtype=jnp.float32)

    # Module init is (1/sqrt(2), 1/sqrt(2), gamma_ri=0, beta=0); perturb the parameters so
    # the cross (gamma_ri) and bias terms are actually exercised by the check.
    beta = 0.1 * jax.random.normal(k_b, (n, 2), dtype=jnp.float32)
    gamma_rr = (1.0 / math.sqrt(2)) + 0.05 * jax.random.normal(k_rr, (n,), dtype=jnp.float32)
    gamma_ii = (1.0 / math.sqrt(2)) + 0.05 * jax.random.normal(k_ii, (n,), dtype=jnp.float32)
    gamma_ri = 0.1 * jax.random.normal(k_ri, (n,), dtype=jnp.float32)

    fn = jax.jit(complex_layer_norm)
    out = jax.block_until_ready(fn(x, beta, gamma_rr, gamma_ii, gamma_ri))

    ref = complex_layer_norm_ref(x, beta, gamma_rr, gamma_ii, gamma_ri)
    assert out.shape == x.shape and out.dtype == x.dtype
    assert jnp.allclose(out, ref, atol=1e-5, rtol=1e-5), "mismatch vs reference"

    print("KERNEL_OK")
</pallas_src>

<mosaic_0001>
module attributes {stable_mosaic.version = 11 : i64} {
  func.func @_cln_kernel(%arg0: i32, %arg1: memref<128x128xf32, #tpu.memory_space<vmem>>, %arg2: memref<3x128xf32, #tpu.memory_space<vmem>>, %arg3: memref<128x128xf32, #tpu.memory_space<vmem>>) attributes {dimension_semantics = [#tpu.dimension_semantics<parallel>], iteration_bounds = array<i64: 2>, scalar_prefetch = 0 : i64, scratch_operands = 0 : i64, tpu.core_type = #tpu.core_type<tc>, window_params = [{transform_indices = @transform_0, window_bounds = array<i64: 128, 128>}, {pipeline_mode = #tpu.pipeline_mode<synchronous>, transform_indices = @transform_1, window_bounds = array<i64: 3, 128>}, {transform_indices = @transform_2, window_bounds = array<i64: 128, 128>}]} {
    %c0 = arith.constant 0 : index
    %c0_0 = arith.constant 0 : index
    %0 = vector.load %arg1[%c0, %c0_0] : memref<128x128xf32, #tpu.memory_space<vmem>>, vector<128x128xf32>
    %1 = tpu.iota {dimensions = array<i32: 1>} : vector<128x128xi32>
    %c1_i32 = arith.constant 1 : i32
    %2 = vector.broadcast %c1_i32 : i32 to vector<128x128xi32>
    %3 = arith.andi %1, %2 : vector<128x128xi32>
    %c0_i32 = arith.constant 0 : i32
    %4 = vector.broadcast %c0_i32 : i32 to vector<128x128xi32>
    %5 = arith.cmpi eq, %3, %4 : vector<128x128xi32>
    %cst = arith.constant 0.000000e+00 : f32
    %6 = vector.broadcast %cst : f32 to vector<128x128xf32>
    %7 = arith.select %5, %0, %6 : vector<128x128xi1>, vector<128x128xf32>
    %cst_1 = arith.constant dense<0.000000e+00> : vector<128xf32>
    %8 = vector.multi_reduction <add>, %7, %cst_1 [1] : vector<128x128xf32> to vector<128xf32>
    %9 = vector.shape_cast %8 : vector<128xf32> to vector<128x1xf32>
    %10 = arith.select %5, %6, %0 : vector<128x128xi1>, vector<128x128xf32>
    %cst_2 = arith.constant dense<0.000000e+00> : vector<128xf32>
    %11 = vector.multi_reduction <add>, %10, %cst_2 [1] : vector<128x128xf32> to vector<128xf32>
    %12 = vector.shape_cast %11 : vector<128xf32> to vector<128x1xf32>
    %13 = vector.shape_cast %9 : vector<128x1xf32> to vector<128x1xf32>
    %14 = vector.broadcast %13 : vector<128x1xf32> to vector<128x128xf32>
    %15 = vector.shape_cast %12 : vector<128x1xf32> to vector<128x1xf32>
    %16 = vector.broadcast %15 : vector<128x1xf32> to vector<128x128xf32>
    %17 = arith.select %5, %14, %16 : vector<128x128xi1>, vector<128x128xf32>
    %cst_3 = arith.constant 1.562500e-02 : f32
    %18 = vector.broadcast %cst_3 : f32 to vector<128x128xf32>
    %19 = arith.mulf %17, %18 : vector<128x128xf32>
    %20 = arith.subf %0, %19 : vector<128x128xf32>
    %21 = arith.mulf %20, %20 : vector<128x128xf32>
    %cst_4 = arith.constant dense<0.000000e+00> : vector<128xf32>
    %22 = vector.multi_reduction <add>, %21, %cst_4 [1] : vector<128x128xf32> to vector<128xf32>
    %23 = vector.shape_cast %22 : vector<128xf32> to vector<128x1xf32>
    %cst_5 = arith.constant 0.0158730168 : f32
    %24 = vector.broadcast %cst_5 : f32 to vector<128x1xf32>
    %25 = arith.mulf %23, %24 : vector<128x1xf32>
    %cst_6 = arith.constant 9.99999971E-10 : f32
    %26 = vector.broadcast %cst_6 : f32 to vector<128x1xf32>
    %27 = arith.addf %25, %26 : vector<128x1xf32>
    %28 = math.rsqrt %27 : vector<128x1xf32>
    %29 = vector.broadcast %28 : vector<128x1xf32> to vector<128x128xf32>
    %30 = arith.mulf %20, %29 : vector<128x128xf32>
    %c0_7 = arith.constant 0 : index
    %c0_8 = arith.constant 0 : index
    %31 = vector.load %arg2[%c0_7, %c0_8] : memref<3x128xf32, #tpu.memory_space<vmem>>, vector<3x128xf32>
    %32 = vector.extract_strided_slice %31 {offsets = [0, 0], sizes = [1, 128], strides = [1, 1]} : vector<3x128xf32> to vector<1x128xf32>
    %33 = vector.extract_strided_slice %31 {offsets = [1, 0], sizes = [1, 128], strides = [1, 1]} : vector<3x128xf32> to vector<1x128xf32>
    %34 = vector.extract_strided_slice %31 {offsets = [2, 0], sizes = [1, 128], strides = [1, 1]} : vector<3x128xf32> to vector<1x128xf32>
    %35 = vector.broadcast %33 : vector<1x128xf32> to vector<128x128xf32>
    %36 = arith.mulf %30, %35 : vector<128x128xf32>
    %c127_i32 = arith.constant 127 : i32
    %37 = tpu.dynamic_rotate %36 by %c127_i32 dim 1 : vector<128x128xf32>, i32 -> vector<128x128xf32>
    %c1_i32_9 = arith.constant 1 : i32
    %38 = tpu.dynamic_rotate %36 by %c1_i32_9 dim 1 : vector<128x128xf32>, i32 -> vector<128x128xf32>
    %39 = arith.select %5, %37, %38 : vector<128x128xi1>, vector<128x128xf32>
    %40 = vector.broadcast %32 : vector<1x128xf32> to vector<128x128xf32>
    %41 = arith.mulf %30, %40 : vector<128x128xf32>
    %42 = arith.addf %41, %39 : vector<128x128xf32>
    %43 = vector.broadcast %34 : vector<1x128xf32> to vector<128x128xf32>
    %44 = arith.addf %42, %43 : vector<128x128xf32>
    %c0_10 = arith.constant 0 : index
    %c0_11 = arith.constant 0 : index
    %45 = vector.load %arg3[%c0_10, %c0_11] : memref<128x128xf32, #tpu.memory_space<vmem>>, vector<128x128xf32>
    tpu.vector_store %arg3[%c0_10, %c0_11], %44 {strides = array<i32>} : memref<128x128xf32, #tpu.memory_space<vmem>>, vector<128x128xf32>,
    return
  }
  func.func @transform_0(%arg0: i32) -> (i32, i32) {
    %c0_i32 = arith.constant 0 : i32
    %c0_i32_0 = arith.constant 0 : i32
    return %arg0, %c0_i32 : i32, i32
  }
  func.func @transform_1(%arg0: i32) -> (i32, i32) {
    %c0_i32 = arith.constant 0 : i32
    %c0_i32_0 = arith.constant 0 : i32
    %c0_i32_1 = arith.constant 0 : i32
    return %c0_i32, %c0_i32_0 : i32, i32
  }
  func.func @transform_2(%arg0: i32) -> (i32, i32) {
    %c0_i32 = arith.constant 0 : i32
    %c0_i32_0 = arith.constant 0 : i32
    return %arg0, %c0_i32 : i32, i32
  }
}

</mosaic_0001>

<bundles_post_ra>
// kernel: complex_layer_norm.1
= control target key start
LH: loop header
LB: loop body
LE: loop exit
PB: predicated region body
PF: predicated region fallthrough
CT: control target
= control target key end

     0   :  { %s730_s9 = smov 0   ;;  %s1288_s0 = inlined_call_operand.vmem [shape: f32[256,128], index: 0, kind: input, shape index: {}]   ;;  %s1289_s1 = inlined_call_operand.vmem [shape: f32[3,128], index: 1, kind: input, shape index: {}]   ;;  %s1290_s2 = inlined_call_operand.vmem [shape: f32[256,128], index: 2, kind: output, shape index: {}]  }
   0x1 LB: > { %s652_s10 = sadd.s32 4294967295, %s711_s9   ;;  %p656_p0 = scmp.ge.s32.totalorder %s711_s9, 1  ;;  %s711_s9 = sphi %s730_s9, %s12_s9  }
   0x2   : > { %p113_p1 = scmp.lt.s32.totalorder %s711_s9, 3 }
   0x4   : > { %p114_p2 = pnand %p656_p0, %p113_p1 }
   0x5   : > { %s657_s11 = sshll.u32 (!%p114_p2), %s652_s10, 4  ;;  %v163_v0 = vlaneseq (!%p114_p2)  ;;  %s713_s18 = smov (!%p114_p2), 127  }
   0x6   : > { %117 = sbr.rel (%p114_p2) target bundleno = 546 (0x222), region = 28  ;;  %p136_p3 = scmp.lt.s32.totalorder (!%p114_p2), %s657_s11, 31 }
   0x7   : > { %v164_v1 = vand.u32 (!%p114_p2), 127, %v163_v0  ;;  %s714_s19 = smov (!%p114_p2), 1  }
   0x9   : > { %v165_v2 = vand.u32 (!%p114_p2), 1, %v164_v1 }
   0xb   : > { %vm749_vm0 = vcmp.eq.s32.totalorder (!%p114_p2), %v165_v2, 0 }
   0xd   : > { %s1294_s11 = smov (!%p136_p3, %s657_s11), 31 }
   0xe   : > { %s658_s12 = sshll.u32 %s1294_s11, 3 }
   0xf   : > { %s747_s15 = scalar_lea.vmem %s1288_s0, %s658_s12  ;;  %s1182_s22 = scalar_lea.vmem %s1290_s2, %s658_s12 }
  0x10   : > { %v754_v4 = vld [vmem:[%s747_s15 + $0x10] sm:$0xff]  ;;  %v757_v5 = vld [vmem:[%s747_s15] sm:$0xff]  ;;  %v760_v6 = vld [vmem:[%s747_s15 + $0x18] sm:$0xff] }
  0x11   : > { %v169_v7 = vsel %vm749_vm0, %v754_v4, 0.0  ;;  %v167_v8 = vsel %vm749_vm0, %v757_v5, 0.0  ;;  %v769_v9 = vld [vmem:[%s747_s15 + $0x8] sm:$0xff]  ;;  %v170_v10 = vsel %vm749_vm0, %v760_v6, 0.0  ;;  %v781_v13 = vld [vmem:[%s747_s15 + $0x20] sm:$0xff]  ;;  %v790_v16 = vld [vmem:[%s747_s15 + $0x38] sm:$0xff] }
  0x12   : > { %187 = vadd.xlane.f32.xlu1 %v169_v7  ;;  %183 = vadd.xlane.f32.xlu0 %v167_v8  ;;  %v168_v11 = vsel %vm749_vm0, %v769_v9, 0.0  ;;  %v778_v12 = vld [vmem:[%s747_s15 + $0x28] sm:$0xff]  ;;  %v171_v15 = vsel %vm749_vm0, %v781_v13, 0.0  ;;  %v793_v17 = vld [vmem:[%s747_s15 + $0x30] sm:$0xff]  ;;  %v174_v18 = vsel %vm749_vm0, %v790_v16, 0.0  ;;  %v805_v21 = vld [vmem:[%s747_s15 + $0x40] sm:$0xff] }
  0x13   : > { %v172_v14 = vsel %vm749_vm0, %v778_v12, 0.0  ;;  %v173_v19 = vsel %vm749_vm0, %v793_v17, 0.0  ;;  %v802_v20 = vld [vmem:[%s747_s15 + $0x48] sm:$0xff]  ;;  %v175_v23 = vsel %vm749_vm0, %v805_v21, 0.0  ;;  %v814_v24 = vld [vmem:[%s747_s15 + $0x58] sm:$0xff]  ;;  %v817_v25 = vld [vmem:[%s747_s15 + $0x50] sm:$0xff] }
  0x14   : > { %v176_v22 = vsel %vm749_vm0, %v802_v20, 0.0  ;;  %v178_v26 = vsel %vm749_vm0, %v814_v24, 0.0  ;;  %v177_v27 = vsel %vm749_vm0, %v817_v25, 0.0  ;;  %v826_v28 = vld [vmem:[%s747_s15 + $0x68] sm:$0xff]  ;;  %v829_v29 = vld [vmem:[%s747_s15 + $0x60] sm:$0xff]  ;;  %v838_v32 = vld [vmem:[%s747_s15 + $0x78] sm:$0xff] }
  0x15   : > { %v180_v30 = vsel %vm749_vm0, %v826_v28, 0.0  ;;  %v179_v31 = vsel %vm749_vm0, %v829_v29, 0.0  ;;  %v841_v33 = vld [vmem:[%s747_s15 + $0x70] sm:$0xff]  ;;  %v182_v34 = vsel %vm749_vm0, %v838_v32, 0.0  ;;  %v216_v36 = vsel %vm749_vm0, 0.0, %v769_v9 }
  0x16   : > { %189 = vadd.xlane.f32.xlu1 %v170_v10  ;;  %185 = vadd.xlane.f32.xlu0 %v168_v11  ;;  %v181_v35 = vsel %vm749_vm0, %v841_v33, 0.0  ;;  %v215_v37 = vsel %vm749_vm0, 0.0, %v757_v5  ;;  %v218_v38 = vsel %vm749_vm0, 0.0, %v760_v6  ;;  %v217_v39 = vsel %vm749_vm0, 0.0, %v754_v4 }
  0x17   : > { %v220_v40 = vsel %vm749_vm0, 0.0, %v778_v12  ;;  %v219_v41 = vsel %vm749_vm0, 0.0, %v781_v13  ;;  %v222_v42 = vsel %vm749_vm0, 0.0, %v790_v16  ;;  %v221_v43 = vsel %vm749_vm0, 0.0, %v793_v17 }
  0x18   : > { %v224_v44 = vsel %vm749_vm0, 0.0, %v802_v20  ;;  %v223_v45 = vsel %vm749_vm0, 0.0, %v805_v21  ;;  %v226_v46 = vsel %vm749_vm0, 0.0, %v814_v24  ;;  %v225_v47 = vsel %vm749_vm0, 0.0, %v817_v25 }
  0x19   : > { %v228_v48 = vsel %vm749_vm0, 0.0, %v826_v28  ;;  %v227_v49 = vsel %vm749_vm0, 0.0, %v829_v29  ;;  %v230_v50 = vsel %vm749_vm0, 0.0, %v838_v32  ;;  %v229_v51 = vsel %vm749_vm0, 0.0, %v841_v33 }
  0x1a   : > { %193 = vadd.xlane.f32.xlu1 %v172_v14  ;;  %191 = vadd.xlane.f32.xlu0 %v171_v15 }
  0x1e   : > { %197 = vadd.xlane.f32.xlu1 %v174_v18  ;;  %195 = vadd.xlane.f32.xlu0 %v173_v19 }
  0x22   : > { %201 = vadd.xlane.f32.xlu1 %v176_v22  ;;  %199 = vadd.xlane.f32.xlu0 %v175_v23 }
  0x26   : > { %205 = vadd.xlane.f32.xlu1 %v178_v26  ;;  %203 = vadd.xlane.f32.xlu0 %v177_v27 }
  0x2a   : > { %209 = vadd.xlane.f32.xlu1 %v180_v30  ;;  %207 = vadd.xlane.f32.xlu0 %v179_v31 }
  0x2e   : > { %213 = vadd.xlane.f32.xlu1 %v182_v34  ;;  %211 = vadd.xlane.f32.xlu0 %v181_v35 }
  0x32   : > { %233 = vadd.xlane.f32.xlu1 %v216_v36  ;;  %231 = vadd.xlane.f32.xlu0 %v215_v37 }
  0x36   : > { %237 = vadd.xlane.f32.xlu1 %v218_v38  ;;  %235 = vadd.xlane.f32.xlu0 %v217_v39 }
  0x3a   : > { %241 = vadd.xlane.f32.xlu1 %v220_v40  ;;  %239 = vadd.xlane.f32.xlu0 %v219_v41 }
  0x3e   : > { %245 = vadd.xlane.f32.xlu1 %v222_v42  ;;  %243 = vadd.xlane.f32.xlu0 %v221_v43 }
  0x42   : > { %249 = vadd.xlane.f32.xlu1 %v224_v44  ;;  %247 = vadd.xlane.f32.xlu0 %v223_v45 }
  0x46   : > { %253 = vadd.xlane.f32.xlu1 %v226_v46  ;;  %251 = vadd.xlane.f32.xlu0 %v225_v47 }
  0x4a   : > { %257 = vadd.xlane.f32.xlu1 %v228_v48  ;;  %255 = vadd.xlane.f32.xlu0 %v227_v49 }
  0x4e   : > { %261 = vadd.xlane.f32.xlu1 %v230_v50  ;;  %259 = vadd.xlane.f32.xlu0 %v229_v51 }
  0x9f   : > { %v188_v52 = vpop.xlane.xlu1 %187  ;;  %v184_v53 = vpop.xlane.xlu0 %183 }
  0xa3   : > { %v190_v54 = vpop.xlane.xlu1 %189  ;;  %v186_v55 = vpop.xlane.xlu0 %185 }
  0xa7   : > { %v194_v56 = vpop.xlane.xlu1 %193  ;;  %v192_v57 = vpop.xlane.xlu0 %191 }
  0xab   : > { %v198_v58 = vpop.xlane.xlu1 %197  ;;  %v196_v59 = vpop.xlane.xlu0 %195 }
  0xaf   : > { %v202_v60 = vpop.xlane.xlu1 %201  ;;  %v200_v61 = vpop.xlane.xlu0 %199 }
  0xb3   : > { %v897_v62 = vpop.xlane.xlu1 %205  ;;  %v899_v63 = vpop.xlane.xlu0 %203 }
  0xb7   : > { %v901_v1 = vpop.xlane.xlu1 %209  ;;  %v903_v2 = vpop.xlane.xlu0 %207 }
  0xbb   : > { %v905_v7 = vpop.xlane.xlu1 %213  ;;  %v907_v8 = vpop.xlane.xlu0 %211 }
  0xbf   : > { %v234_v10 = vpop.xlane.xlu1 %233  ;;  %v232_v11 = vpop.xlane.xlu0 %231 }
  0xc0   : > { %v264_v14 = vsel %vm749_vm0, %v186_v55, %v234_v10  ;;  %v263_v15 = vsel %vm749_vm0, %v184_v53, %v232_v11 }
  0xc1   : > { %v280_v18 = vmul.f32 0.015625, %v264_v14  ;;  %v279_v19 = vmul.f32 0.015625, %v263_v15 }
  0xc3   : > { %v238_v22 = vpop.xlane.xlu1 %237  ;;  %v236_v23 = vpop.xlane.xlu0 %235  ;;  %v914_v26 = vsub.f32 %v769_v9, %v280_v18  ;;  %v917_v27 = vsub.f32 %v757_v5, %v279_v19 }
  0xc4   : > { %v266_v30 = vsel %vm749_vm0, %v190_v54, %v238_v22  ;;  %v265_v31 = vsel %vm749_vm0, %v188_v52, %v236_v23 }
  0xc5   : > { %v282_v34 = vmul.f32 0.015625, %v266_v30  ;;  %v281_v35 = vmul.f32 0.015625, %v265_v31  ;;  %v312_v36 = vmul.f32 %v914_v26, %v914_v26  ;;  %v311_v37 = vmul.f32 %v917_v27, %v917_v27 }
  0xc7   : > { %v242_v38 = vpop.xlane.xlu1 %241  ;;  %329 = vadd.xlane.f32.xlu1 %v312_v36  ;;  %327 = vadd.xlane.f32.xlu0 %v311_v37  ;;  %v240_v9 = vpop.xlane.xlu0 %239  ;;  %v928_v5 = vsub.f32 %v760_v6, %v282_v34  ;;  %v931_v39 = vsub.f32 %v754_v4, %v281_v35 }
  0xc8   : > { %v268_v40 = vsel %vm749_vm0, %v194_v56, %v242_v38  ;;  %v267_v41 = vsel %vm749_vm0, %v192_v57, %v240_v9 }
  0xc9   : > { %v284_v42 = vmul.f32 0.015625, %v268_v40  ;;  %v283_v43 = vmul.f32 0.015625, %v267_v41  ;;  %v314_v44 = vmul.f32 %v928_v5, %v928_v5  ;;  %v313_v45 = vmul.f32 %v931_v39, %v931_v39 }
  0xcb   : > { %v246_v46 = vpop.xlane.xlu1 %245  ;;  %333 = vadd.xlane.f32.xlu1 %v314_v44  ;;  %331 = vadd.xlane.f32.xlu0 %v313_v45  ;;  %v244_v6 = vpop.xlane.xlu0 %243  ;;  %v942_v4 = vsub.f32 %v778_v12, %v284_v42  ;;  %v945_v47 = vsub.f32 %v781_v13, %v283_v43 }
  0xcc   : > { %v270_v48 = vsel %vm749_vm0, %v198_v58, %v246_v46  ;;  %v269_v49 = vsel %vm749_vm0, %v196_v59, %v244_v6 }
  0xcd   : > { %v286_v50 = vmul.f32 0.015625, %v270_v48  ;;  %v285_v51 = vmul.f32 0.015625, %v269_v49  ;;  %v316_v52 = vmul.f32 %v942_v4, %v942_v4  ;;  %v315_v53 = vmul.f32 %v945_v47, %v945_v47 }
  0xcf   : > { %v250_v54 = vpop.xlane.xlu1 %249  ;;  %337 = vadd.xlane.f32.xlu1 %v316_v52  ;;  %335 = vadd.xlane.f32.xlu0 %v315_v53  ;;  %v248_v12 = vpop.xlane.xlu0 %247  ;;  %v956_v13 = vsub.f32 %v790_v16, %v286_v50  ;;  %v959_v55 = vsub.f32 %v793_v17, %v285_v51  ;;  %v1028_v52 = vshrl.u32 %v163_v0, 7 }
  0xd0   : > { %v272_v56 = vsel %vm749_vm0, %v202_v60, %v250_v54  ;;  %v271_v57 = vsel %vm749_vm0, %v200_v61, %v248_v12 }
  0xd1   : > { %v288_v58 = vmul.f32 0.015625, %v272_v56  ;;  %v287_v59 = vmul.f32 0.015625, %v271_v57  ;;  %v318_v10 = vmul.f32 %v956_v13, %v956_v13  ;;  %v317_v11 = vmul.f32 %v959_v55, %v959_v55 }
  0xd3   : > { %v254_v14 = vpop.xlane.xlu1 %253  ;;  %341 = vadd.xlane.f32.xlu1 %v318_v10  ;;  %339 = vadd.xlane.f32.xlu0 %v317_v11  ;;  %v252_v16 = vpop.xlane.xlu0 %251  ;;  %v970_v17 = vsub.f32 %v802_v20, %v288_v58  ;;  %v973_v60 = vsub.f32 %v805_v21, %v287_v59  ;;  %v426_v59 = vsub.s32 1, %v1028_v52 }
  0xd4   : > { %v274_v61 = vsel %vm749_vm0, %v897_v62, %v254_v14  ;;  %v273_v15 = vsel %vm749_vm0, %v899_v63, %v252_v16  ;;  %v1034_v14 = vld [vmem:[%s1289_s1] sm:$0x7] }
  0xd5   : > { %v290_v18 = vmul.f32 0.015625, %v274_v61  ;;  %v289_v19 = vmul.f32 0.015625, %v273_v15  ;;  %v320_v22 = vmul.f32 %v970_v17, %v970_v17  ;;  %v319_v20 = vmul.f32 %v973_v60, %v973_v60 }
  0xd7   : > { %v258_v23 = vpop.xlane.xlu1 %257  ;;  %345 = vadd.xlane.f32.xlu1 %v320_v22  ;;  %343 = vadd.xlane.f32.xlu0 %v319_v20  ;;  %v256_v21 = vpop.xlane.xlu0 %255  ;;  %v986_v30 = vsub.f32 %v814_v24, %v290_v18  ;;  %v989_v62 = vsub.f32 %v817_v25, %v289_v19  ;;  %v1037_v18 = vrot.slane %v1034_v14, %v426_v59 }
  0xd8   : > { %v276_v63 = vsel %vm749_vm0, %v901_v1, %v258_v23  ;;  %v275_v31 = vsel %vm749_vm0, %v903_v2, %v256_v21 }
  0xd9   : > { %v292_v34 = vmul.f32 0.015625, %v276_v63  ;;  %v291_v35 = vmul.f32 0.015625, %v275_v31  ;;  %v322_v36 = vmul.f32 %v986_v30, %v986_v30  ;;  %v321_v24 = vmul.f32 %v989_v62, %v989_v62 }
  0xdb   : > { %v262_v37 = vpop.xlane.xlu1 %261  ;;  %349 = vadd.xlane.f32.xlu1 %v322_v36  ;;  %347 = vadd.xlane.f32.xlu0 %v321_v24  ;;  %v260_v25 = vpop.xlane.xlu0 %259  ;;  %v1002_v38 = vsub.f32 %v826_v28, %v292_v34  ;;  %v1005_v1 = vsub.f32 %v829_v29, %v291_v35 }
  0xdc   : > { %v278_v2 = vsel %vm749_vm0, %v905_v7, %v262_v37  ;;  %v277_v9 = vsel %vm749_vm0, %v907_v8, %v260_v25 }
  0xdd   : > { %v294_v40 = vmul.f32 0.015625, %v278_v2  ;;  %v293_v41 = vmul.f32 0.015625, %v277_v9  ;;  %v324_v42 = vmul.f32 %v1002_v38, %v1002_v38  ;;  %v323_v28 = vmul.f32 %v1005_v1, %v1005_v1 }
  0xdf   : > { %353 = vadd.xlane.f32.xlu1 %v324_v42  ;;  %351 = vadd.xlane.f32.xlu0 %v323_v28  ;;  %v1018_v29 = vsub.f32 %v838_v32, %v294_v40  ;;  %v1021_v43 = vsub.f32 %v841_v33, %v293_v41 }
  0xe1   : > { %v326_v7 = vmul.f32 %v1018_v29, %v1018_v29  ;;  %v325_v8 = vmul.f32 %v1021_v43, %v1021_v43 }
  0xe3   : > { %357 = vadd.xlane.f32.xlu1 %v326_v7  ;;  %355 = vadd.xlane.f32.xlu0 %v325_v8 }
 0x154   : > { %v330_v44 = vpop.xlane.xlu1 %329  ;;  %v328_v45 = vpop.xlane.xlu0 %327 }
 0x155   : > { %v360_v46 = vmul.f32 0.015873017, %v330_v44  ;;  %v359_v6 = vmul.f32 0.015873017, %v328_v45 }
 0x157   : > { %v376_v48 = vadd.f32 1e-09, %v360_v46  ;;  %v375_v49 = vadd.f32 1e-09, %v359_v6 }
 0x158   : > { %v334_v50 = vpop.xlane.xlu1 %333  ;;  %v332_v32 = vpop.xlane.xlu0 %331 }
 0x159   : > { %673 = vrsqrt.f32 %v376_v48  ;;  %v362_v51 = vmul.f32 0.015873017, %v334_v50  ;;  %v361_v33 = vmul.f32 0.015873017, %v332_v32 }
 0x15a   : > { %675 = vrsqrt.f32 %v375_v49 }
 0x15b   : > { %v378_v53 = vadd.f32 1e-09, %v362_v51  ;;  %v377_v54 = vadd.f32 1e-09, %v361_v33 }
 0x15c   : > { %v338_v12 = vpop.xlane.xlu1 %337  ;;  %v336_v56 = vpop.xlane.xlu0 %335 }
 0x15d   : > { %677 = vrsqrt.f32 %v378_v53  ;;  %v364_v57 = vmul.f32 0.015873017, %v338_v12  ;;  %v363_v58 = vmul.f32 0.015873017, %v336_v56 }
 0x15e   : > { %679 = vrsqrt.f32 %v377_v54 }
 0x15f   : > { %v380_v10 = vadd.f32 1e-09, %v364_v57  ;;  %v379_v11 = vadd.f32 1e-09, %v363_v58 }
 0x160   : > { %v342_v16 = vpop.xlane.xlu1 %341  ;;  %v340_v0 = vpop.xlane.xlu0 %339 }
 0x161   : > { %681 = vrsqrt.f32 %v380_v10  ;;  %v366_v61 = vmul.f32 0.015873017, %v342_v16  ;;  %v365_v15 = vmul.f32 0.015873017, %v340_v0 }
 0x162   : > { %683 = vrsqrt.f32 %v379_v11 }
 0x163   : > { %v674_v19 = vpop.eup %673  ;;  %v382_v22 = vadd.f32 1e-09, %v366_v61  ;;  %v381_v20 = vadd.f32 1e-09, %v365_v15 }
 0x164   : > { %v676_v23 = vpop.eup %675  ;;  %v346_v21 = vpop.xlane.xlu1 %345  ;;  %v1040_v31 = vmul.f32 %v674_v19, %v914_v26 }
 0x165   : > { %v344_v63 = vpop.xlane.xlu0 %343  ;;  %685 = vrsqrt.f32 %v382_v22  ;;  %v368_v34 = vmul.f32 0.015873017, %v346_v21  ;;  %v1043_v36 = vmul.f32 %v676_v23, %v917_v27 }
 0x166   : > { %v367_v35 = vmul.f32 0.015873017, %v344_v63  ;;  %687 = vrsqrt.f32 %v381_v20  ;;  %v1047_v24 = vmul.f32 %v1037_v18, %v1040_v31 }
 0x167   : > { %v678_v37 = vpop.eup %677  ;;  %v384_v25 = vadd.f32 1e-09, %v368_v34  ;;  %v1051_v9 = vmul.f32 %v1037_v18, %v1043_v36 }
 0x168   : > { %v383_v2 = vadd.f32 1e-09, %v367_v35  ;;  %v680_v26 = vpop.eup %679  ;;  %446 = vrot.lane.b32.xlu1 %v1047_v24, %s713_s18  ;;  %v350_v40 = vpop.xlane.xlu1 %349  ;;  %v1065_v46 = vmul.f32 %v678_v37, %v928_v5 }
 0x169   : > { %v348_v27 = vpop.xlane.xlu0 %347  ;;  %689 = vrsqrt.f32 %v384_v25  ;;  %v370_v41 = vmul.f32 0.015873017, %v350_v40  ;;  %444 = vrot.lane.b32.xlu0 %v1051_v9, %s713_s18  ;;  %v1058_v28 = vmul.f32 %v680_v26, %v931_v39 }
 0x16a   : > { %v369_v42 = vmul.f32 0.015873017, %v348_v27  ;;  %691 = vrsqrt.f32 %v383_v2  ;;  %v431_v54 = vmul.f32 %v1037_v18, %v1065_v46 }
 0x16b   : > { %v682_v7 = vpop.eup %681  ;;  %v386_v8 = vadd.f32 1e-09, %v370_v41  ;;  %v1062_v45 = vmul.f32 %v1037_v18, %v1058_v28 }
 0x16c   : > { %v385_v44 = vadd.f32 1e-09, %v369_v42  ;;  %v684_v6 = vpop.eup %683  ;;  %v354_v48 = vpop.xlane.xlu1 %353  ;;  %v1073_v51 = vmul.f32 %v682_v7, %v942_v4 }
 0x16d   : > { %v352_v49 = vpop.xlane.xlu0 %351  ;;  %693 = vrsqrt.f32 %v386_v8  ;;  %v372_v50 = vmul.f32 0.015873017, %v354_v48  ;;  %448 = vrot.lane.b32.xlu1 %v1062_v45, %s713_s18  ;;  %v1070_v32 = vmul.f32 %v684_v6, %v945_v47 }
 0x16e   : > { %v371_v39 = vmul.f32 0.015873017, %v352_v49  ;;  %695 = vrsqrt.f32 %v385_v44  ;;  %v433_v10 = vmul.f32 %v1037_v18, %v1073_v51 }
 0x16f   : > { %v686_v33 = vpop.eup %685  ;;  %v388_v53 = vadd.f32 1e-09, %v372_v50  ;;  %v432_v12 = vmul.f32 %v1037_v18, %v1070_v32 }
 0x170   : > { %v387_v5 = vadd.f32 1e-09, %v371_v39  ;;  %v688_v56 = vpop.eup %687  ;;  %v358_v57 = vpop.xlane.xlu1 %357  ;;  %v1089_v15 = vmul.f32 %v686_v33, %v956_v13  ;;  %v526_v39 = vsub.s32 0, %v1028_v52 }
 0x171   : > { %v356_v58 = vpop.xlane.xlu0 %355  ;;  %697 = vrsqrt.f32 %v388_v53  ;;  %v374_v59 = vmul.f32 0.015873017, %v358_v57  ;;  %450 = vrot.lane.b32.xlu1 %v431_v54, %s713_s18  ;;  %452 = vrot.lane.b32.xlu0 %v432_v12, %s713_s18  ;;  %v1082_v47 = vmul.f32 %v688_v56, %v959_v55 }
 0x172   : > { %v373_v4 = vmul.f32 0.015873017, %v356_v58  ;;  %699 = vrsqrt.f32 %v387_v5  ;;  %v435_v20 = vmul.f32 %v1037_v18, %v1089_v15  ;;  %v1165_v5 = vrot.slane %v1034_v14, %v526_v39 }
 0x173   : > { %v690_v11 = vpop.eup %689  ;;  %v390_v16 = vadd.f32 1e-09, %v374_v59  ;;  %v434_v61 = vmul.f32 %v1037_v18, %v1082_v47 }
 0x174   : > { %v389_v0 = vadd.f32 1e-09, %v373_v4  ;;  %v692_v19 = vpop.eup %691  ;;  %v1101_v13 = vmul.f32 %v690_v11, %v970_v17  ;;  %v528_v56 = vmul.f32 %v1165_v5, %v1043_v36  ;;  %v529_v36 = vmul.f32 %v1165_v5, %v1040_v31 }
 0x175   : > { %701 = vrsqrt.f32 %v390_v16  ;;  %454 = vrot.lane.b32.xlu1 %v433_v10, %s713_s18  ;;  %456 = vrot.lane.b32.xlu0 %v434_v61, %s713_s18  ;;  %v1094_v55 = vmul.f32 %v692_v19, %v973_v60 }
 0x176   : > { %703 = vrsqrt.f32 %v389_v0  ;;  %v437_v34 = vmul.f32 %v1037_v18, %v1101_v13 }
 0x177   : > { %v694_v22 = vpop.eup %693  ;;  %v436_v23 = vmul.f32 %v1037_v18, %v1094_v55 }
 0x178   : > { %v696_v21 = vpop.eup %695  ;;  %v1113_v37 = vmul.f32 %v694_v22, %v986_v30 }
 0x179   : > { %458 = vrot.lane.b32.xlu1 %v435_v20, %s713_s18  ;;  %460 = vrot.lane.b32.xlu0 %v436_v23, %s713_s18  ;;  %v1106_v63 = vmul.f32 %v696_v21, %v989_v62 }
 0x17a   : > { %v439_v2 = vmul.f32 %v1037_v18, %v1113_v37 }
 0x17b   : > { %v698_v60 = vpop.eup %697  ;;  %v438_v35 = vmul.f32 %v1037_v18, %v1106_v63 }
 0x17c   : > { %v700_v17 = vpop.eup %699  ;;  %v1125_v40 = vmul.f32 %v698_v60, %v1002_v38 }
 0x17d   : > { %462 = vrot.lane.b32.xlu1 %v437_v34, %s713_s18  ;;  %464 = vrot.lane.b32.xlu0 %v438_v35, %s713_s18  ;;  %v1118_v25 = vmul.f32 %v700_v17, %v1005_v1 }
 0x17e   : > { %v441_v1 = vmul.f32 %v1037_v18, %v1125_v40 }
 0x17f   : > { %v702_v62 = vpop.eup %701  ;;  %v440_v26 = vmul.f32 %v1037_v18, %v1118_v25 }
 0x180   : > { %v704_v30 = vpop.eup %703  ;;  %v1137_v42 = vmul.f32 %v702_v62, %v1018_v29 }
 0x181   : > { %466 = vrot.lane.b32.xlu1 %v439_v2, %s713_s18  ;;  %468 = vrot.lane.b32.xlu0 %v440_v26, %s713_s18  ;;  %v1130_v27 = vmul.f32 %v704_v30, %v1021_v43 }
 0x182   : > { %v443_v38 = vmul.f32 %v1037_v18, %v1137_v42 }
 0x183   : > { %v442_v41 = vmul.f32 %v1037_v18, %v1130_v27 }
 0x185   : > { %470 = vrot.lane.b32.xlu1 %v441_v1, %s713_s18  ;;  %472 = vrot.lane.b32.xlu0 %v442_v41, %s713_s18 }
 0x189   : > { %474 = vrot.lane.b32.xlu1 %v443_v38, %s713_s18  ;;  %476 = vrot.lane.b32.xlu0 %v1051_v9, %s714_s19 }
 0x18d   : > { %478 = vrot.lane.b32.xlu1 %v1047_v24, %s714_s19  ;;  %480 = vrot.lane.b32.xlu0 %v1062_v45, %s714_s19 }
 0x191   : > { %482 = vrot.lane.b32.xlu1 %v431_v54, %s714_s19  ;;  %484 = vrot.lane.b32.xlu0 %v432_v12, %s714_s19  ;;  %v562_v54 = vsub.s32 2, %v1028_v52 }
 0x193   : > { %v1173_v57 = vrot.slane %v1034_v14, %v562_v54  ;;  %v530_v14 = vmul.f32 %v1165_v5, %v1058_v28  ;;  %v532_v28 = vmul.f32 %v1165_v5, %v1070_v32  ;;  %v533_v32 = vmul.f32 %v1165_v5, %v1073_v51 }
 0x195   : > { %486 = vrot.lane.b32.xlu1 %v433_v10, %s714_s19  ;;  %488 = vrot.lane.b32.xlu0 %v434_v61, %s714_s19 }
 0x199   : > { %490 = vrot.lane.b32.xlu1 %v435_v20, %s714_s19  ;;  %492 = vrot.lane.b32.xlu0 %v436_v23, %s714_s19  ;;  %v531_v20 = vmul.f32 %v1165_v5, %v1065_v46 }
 0x19d   : > { %494 = vrot.lane.b32.xlu1 %v437_v34, %s714_s19  ;;  %496 = vrot.lane.b32.xlu0 %v438_v35, %s714_s19 }
 0x1a1   : > { %498 = vrot.lane.b32.xlu1 %v439_v2, %s714_s19  ;;  %500 = vrot.lane.b32.xlu0 %v440_v26, %s714_s19  ;;  %v534_v26 = vmul.f32 %v1165_v5, %v1082_v47  ;;  %v535_v47 = vmul.f32 %v1165_v5, %v1089_v15 }
 0x1a5   : > { %502 = vrot.lane.b32.xlu1 %v441_v1, %s714_s19  ;;  %504 = vrot.lane.b32.xlu0 %v442_v41, %s714_s19 }
 0x1a9   : > { %506 = vrot.lane.b32.xlu1 %v443_v38, %s714_s19 }
 0x1da   : > { %v447_v29 = vpop.permute.xlu1 %446 }
 0x1db   : > { %v445_v43 = vpop.permute.xlu0 %444 }
 0x1df   : > { %v449_v18 = vpop.permute.xlu1 %448 }
 0x1e3   : > { %v451_v9 = vpop.permute.xlu1 %450  ;;  %v453_v24 = vpop.permute.xlu0 %452 }
 0x1e7   : > { %v455_v7 = vpop.permute.xlu1 %454  ;;  %v457_v8 = vpop.permute.xlu0 %456 }
 0x1eb   : > { %v1147_v44 = vpop.permute.xlu1 %458  ;;  %v1149_v45 = vpop.permute.xlu0 %460 }
 0x1ef   : > { %v1151_v6 = vpop.permute.xlu1 %462  ;;  %v1153_v48 = vpop.permute.xlu0 %464 }
 0x1f3   : > { %v1155_v49 = vpop.permute.xlu1 %466  ;;  %v1157_v50 = vpop.permute.xlu0 %468 }
 0x1f7   : > { %v1160_v33 = vpop.permute.xlu1 %470  ;;  %v1162_v53 = vpop.permute.xlu0 %472 }
 0x1fb   : > { %v1168_v12 = vpop.permute.xlu1 %474  ;;  %v477_v58 = vpop.permute.xlu0 %476 }
 0x1fc   : > { %v508_v59 = vsel %vm749_vm0, %v445_v43, %v477_v58 }
 0x1fd   : > { %v544_v4 = vadd.f32 %v528_v56, %v508_v59  ;;  %v538_v59 = vmul.f32 %v1165_v5, %v1106_v63  ;;  %v539_v63 = vmul.f32 %v1165_v5, %v1113_v37 }
 0x1ff   : > { %v564_v52 = vadd.f32 %v1173_v57, %v544_v4  ;;  %v479_v10 = vpop.permute.xlu1 %478  ;;  %v481_v11 = vpop.permute.xlu0 %480 }
 0x200   : > { %v509_v16 = vsel %vm749_vm0, %v447_v29, %v479_v10  ;;  %v510_v0 = vsel %vm749_vm0, %v449_v18, %v481_v11  ;;  %v540_v11 = vmul.f32 %v1165_v5, %v1118_v25  ;;  %v541_v25 = vmul.f32 %v1165_v5, %v1125_v40 }
 0x201   : > { %580 = vst [vmem:[%s1182_s22] sm:$0xff] %v564_v52  ;;  %v545_v61 = vadd.f32 %v529_v36, %v509_v16  ;;  %v546_v19 = vadd.f32 %v530_v14, %v510_v0 }
 0x203   : > { %v565_v22 = vadd.f32 %v1173_v57, %v545_v61  ;;  %v566_v31 = vadd.f32 %v1173_v57, %v546_v19  ;;  %v483_v23 = vpop.permute.xlu1 %482  ;;  %v485_v21 = vpop.permute.xlu0 %484 }
 0x204   : > { %v511_v60 = vsel %vm749_vm0, %v451_v9, %v483_v23  ;;  %v512_v34 = vsel %vm749_vm0, %v453_v24, %v485_v21  ;;  %v536_v9 = vmul.f32 %v1165_v5, %v1094_v55  ;;  %v537_v55 = vmul.f32 %v1165_v5, %v1101_v13 }
 0x205   : > { %581 = vst [vmem:[%s1182_s22 + $0x8] sm:$0xff] %v565_v22  ;;  %582 = vst [vmem:[%s1182_s22 + $0x10] sm:$0xff] %v566_v31  ;;  %v547_v35 = vadd.f32 %v531_v20, %v511_v60  ;;  %v548_v17 = vadd.f32 %v532_v28, %v512_v34 }
 0x207   : > { %v567_v62 = vadd.f32 %v1173_v57, %v547_v35  ;;  %v568_v46 = vadd.f32 %v1173_v57, %v548_v17  ;;  %v487_v2 = vpop.permute.xlu1 %486  ;;  %v489_v30 = vpop.permute.xlu0 %488 }
 0x208   : > { %v513_v1 = vsel %vm749_vm0, %v455_v7, %v487_v2  ;;  %v514_v41 = vsel %vm749_vm0, %v457_v8, %v489_v30 }
 0x209   : > { %583 = vst [vmem:[%s1182_s22 + $0x18] sm:$0xff] %v567_v62  ;;  %584 = vst [vmem:[%s1182_s22 + $0x20] sm:$0xff] %v568_v46  ;;  %v549_v38 = vadd.f32 %v533_v32, %v513_v1  ;;  %v550_v29 = vadd.f32 %v534_v26, %v514_v41 }
 0x20b   : > { %v569_v43 = vadd.f32 %v1173_v57, %v549_v38  ;;  %v570_v51 = vadd.f32 %v1173_v57, %v550_v29  ;;  %v491_v18 = vpop.permute.xlu1 %490  ;;  %v493_v24 = vpop.permute.xlu0 %492 }
 0x20c   : > { %v515_v7 = vsel %vm749_vm0, %v1147_v44, %v491_v18  ;;  %v516_v8 = vsel %vm749_vm0, %v1149_v45, %v493_v24 }
 0x20d   : > { %585 = vst [vmem:[%s1182_s22 + $0x28] sm:$0xff] %v569_v43  ;;  %586 = vst [vmem:[%s1182_s22 + $0x30] sm:$0xff] %v570_v51  ;;  %v551_v39 = vadd.f32 %v535_v47, %v515_v7  ;;  %v552_v54 = vadd.f32 %v536_v9, %v516_v8 }
 0x20f   : > { %v571_v15 = vadd.f32 %v1173_v57, %v551_v39  ;;  %v572_v56 = vadd.f32 %v1173_v57, %v552_v54  ;;  %v495_v58 = vpop.permute.xlu1 %494  ;;  %v497_v44 = vpop.permute.xlu0 %496 }
 0x210   : > { %v517_v45 = vsel %vm749_vm0, %v1151_v6, %v495_v58  ;;  %v518_v4 = vsel %vm749_vm0, %v1153_v48, %v497_v44 }
 0x211   : > { %587 = vst [vmem:[%s1182_s22 + $0x38] sm:$0xff] %v571_v15  ;;  %588 = vst [vmem:[%s1182_s22 + $0x40] sm:$0xff] %v572_v56  ;;  %v553_v52 = vadd.f32 %v537_v55, %v517_v45  ;;  %v554_v36 = vadd.f32 %v538_v59, %v518_v4 }
 0x213   : > { %v573_v13 = vadd.f32 %v1173_v57, %v553_v52  ;;  %v574_v10 = vadd.f32 %v1173_v57, %v554_v36  ;;  %v499_v14 = vpop.permute.xlu1 %498  ;;  %v501_v6 = vpop.permute.xlu0 %500 }
 0x214   : > { %v519_v48 = vsel %vm749_vm0, %v1155_v49, %v499_v14  ;;  %v520_v16 = vsel %vm749_vm0, %v1157_v50, %v501_v6  ;;  %v542_v49 = vmul.f32 %v1165_v5, %v1130_v27  ;;  %v543_v27 = vmul.f32 %v1165_v5, %v1137_v42 }
 0x215   : > { %589 = vst [vmem:[%s1182_s22 + $0x48] sm:$0xff] %v573_v13  ;;  %590 = vst [vmem:[%s1182_s22 + $0x50] sm:$0xff] %v574_v10  ;;  %v555_v0 = vadd.f32 %v539_v63, %v519_v48  ;;  %v556_v61 = vadd.f32 %v540_v11, %v520_v16 }
 0x217   : > { %v575_v37 = vadd.f32 %v1173_v57, %v555_v0  ;;  %v576_v19 = vadd.f32 %v1173_v57, %v556_v61  ;;  %v503_v22 = vpop.permute.xlu1 %502  ;;  %v505_v31 = vpop.permute.xlu0 %504 }
 0x218   : > { %v521_v50 = vsel %vm749_vm0, %v1160_v33, %v503_v22  ;;  %v522_v20 = vsel %vm749_vm0, %v1162_v53, %v505_v31 }
 0x219   : > { %591 = vst [vmem:[%s1182_s22 + $0x58] sm:$0xff] %v575_v37  ;;  %592 = vst [vmem:[%s1182_s22 + $0x60] sm:$0xff] %v576_v19  ;;  %v557_v23 = vadd.f32 %v541_v25, %v521_v50  ;;  %v558_v28 = vadd.f32 %v542_v49, %v522_v20 }
 0x21b   : > { %v577_v40 = vadd.f32 %v1173_v57, %v557_v23  ;;  %v578_v21 = vadd.f32 %v1173_v57, %v558_v28  ;;  %v507_v60 = vpop.permute.xlu1 %506 }
 0x21c   : > { %v523_v33 = vsel %vm749_vm0, %v1168_v12, %v507_v60 }
 0x21d   : > { %593 = vst [vmem:[%s1182_s22 + $0x68] sm:$0xff] %v577_v40  ;;  %594 = vst [vmem:[%s1182_s22 + $0x70] sm:$0xff] %v578_v21  ;;  %v559_v34 = vadd.f32 %v543_v27, %v523_v33 }
 0x21f   : > { %v579_v53 = vadd.f32 %v1173_v57, %v559_v34 }
 0x221   : > { %595 = vst [vmem:[%s1182_s22 + $0x78] sm:$0xff] %v579_v53 }
 0x222 PF: > { %s12_s9 = sadd.s32 1, %s711_s9  }
 0x223   : > { %p9_p4 = scmp.ge.s32.totalorder %s12_s9, 4  }
 0x225   :  { %11 = sbr.rel (!%p9_p4) target bundleno = 1 (0x1), region = 58 }

</bundles_post_ra>
